<compile_context>
chip_gen: v7x
topology: tpu7x:2x2x1
jax: 0.10.0
libtpu: 0.0.40
codegen_flags: <defaults>
</compile_context>

<pallas_src>
import jax
import jax.numpy as jnp
import numpy as np
from jax.experimental import pallas as pl
from jax.experimental.pallas import tpu as pltpu


def _round_up(x, m):
    return ((x + m - 1) // m) * m


def _choose_batch_tile(b8, tb):
    """Pick the per-step batch tile (multiple of 8) for a padded batch of b8 rows."""
    tb = max(8, (tb // 8) * 8)                 # enforce sublane multiple
    if b8 <= tb:
        if b8 >= 256:
            # Medium batch: two blocks so ("parallel",) can use both v7x TensorCores.
            return _round_up((b8 + 1) // 2, 8)
        return b8                              # tiny batch: single block, no step overhead
    # Large batch: minimize padded rows + per-step overhead
    # (~0.35 us/step ~ 128 row-equivalents of work for this MLP).
    best_t, best_cost = None, None
    for t in range(tb, 7, -8):
        nblk = -(-b8 // t)
        cost = nblk * t + 128 * nblk
        if best_cost is None or cost < best_cost:
            best_t, best_cost = t, cost
    return best_t


def _mlp_kernel(x_ref, w1_ref, b1_ref, w2_ref, b2_ref, w3_ref, b3_ref, o_ref):
    """Fused (linear -> tanh) x 3 on one batch tile.  Weights arrive pre-cast
    (f32 or bf16); matmuls accumulate in f32 on the MXU; bias-add + tanh run in
    the weight dtype (f32 path == exact PyTorch numerics)."""
    cd = w1_ref.dtype
    x = x_ref[...].astype(cd)
    h1 = jnp.tanh(
        jnp.dot(x, w1_ref[...], preferred_element_type=jnp.float32).astype(cd)
        + b1_ref[...])
    h2 = jnp.tanh(
        jnp.dot(h1, w2_ref[...], preferred_element_type=jnp.float32).astype(cd)
        + b2_ref[...])
    h3 = jnp.tanh(
        jnp.dot(h2, w3_ref[...], preferred_element_type=jnp.float32).astype(cd)
        + b3_ref[...])
    # w3/b3 are lane-padded (multiple of 128) so the matmul is lane-dense; store
    # only the real out_dim columns -> 16x less HBM writeback for out_dim=8.
    o_ref[...] = h3[:, : o_ref.shape[-1]].astype(o_ref.dtype)


def prepare_params(params, *, compute_dtype=jnp.float32):
    """One-time preparation, hoisted off the forward path:
      * pad the final layer to a multiple of 128 output columns (lane-dense MXU),
      * cast weights/biases to the compute dtype (bf16 on v6e/v7x halves weight
        DMA and ~doubles EUP/VALU throughput; f32 default matches PyTorch)."""
    w1, b1 = params["w1"], params["b1"]
    w2, b2 = params["w2"], params["b2"]
    w3, b3 = params["w3"], params["b3"]
    out_dim = w3.shape[1]
    n_pad = _round_up(max(out_dim, 128), 128)
    if n_pad != out_dim:
        w3 = jnp.zeros((w3.shape[0], n_pad), w3.dtype).at[:, :out_dim].set(w3)
        b3 = jnp.zeros((1, n_pad), b3.dtype).at[:, :out_dim].set(jnp.reshape(b3, (1, -1)))
    cast = lambda a: jnp.asarray(a).reshape(1, -1).astype(compute_dtype) if a.ndim <= 2 and a.shape[0] == 1 or a.ndim == 1 else a.astype(compute_dtype)
    return {
        "w1": w1.astype(compute_dtype), "b1": jnp.reshape(b1, (1, -1)).astype(compute_dtype),
        "w2": w2.astype(compute_dtype), "b2": jnp.reshape(b2, (1, -1)).astype(compute_dtype),
        "w3": w3.astype(compute_dtype), "b3": jnp.reshape(b3, (1, -1)).astype(compute_dtype),
        "out_dim": out_dim,
    }


def nonlinear_regression_forward(x, prepared, *, tb=512):
    """x: (B, input_dim) float32.  prepared: output of prepare_params()."""
    B, in_dim = x.shape
    w1, b1 = prepared["w1"], prepared["b1"]
    w2, b2 = prepared["w2"], prepared["b2"]
    w3, b3 = prepared["w3"], prepared["b3"]
    out_dim = prepared["out_dim"]
    h1_dim, h2_dim, n_pad = w1.shape[1], w2.shape[1], w3.shape[1]

    # Batch padding / tile choice (ragged batches handled by zero padding).
    b8 = _round_up(B, 8)
    tb_eff = _choose_batch_tile(b8, tb)
    b_pad = _round_up(b8, tb_eff)
    xp = x if b_pad == B else jnp.zeros((b_pad, in_dim), x.dtype).at[:B, :].set(x)
    grid = (b_pad // tb_eff,)

    # Honest VMEM budget: double-buffered x/out tiles, weights counted x2 as
    # slack (they are requested single-buffered), f32 intermediates, headroom.
    w_itemsize = jnp.dtype(w1.dtype).itemsize
    x_itemsize = jnp.dtype(x.dtype).itemsize
    x_tile_b = tb_eff * in_dim * x_itemsize
    out_tile_b = tb_eff * out_dim * x_itemsize
    weights_b = (in_dim * h1_dim + h1_dim + h1_dim * h2_dim + h2_dim
                 + h2_dim * n_pad + n_pad) * w_itemsize
    act_b = tb_eff * (h1_dim + h2_dim + n_pad) * 4
    vmem_bytes = int(min(2 * (x_tile_b + out_tile_b) + 2 * weights_b + act_b
                         + (4 << 20), 64 << 20))

    # Constant-across-grid operands: resident in VMEM, single-buffered.
    def const_spec(shape):
        return pl.BlockSpec(shape, lambda i: (0, 0), pipeline_mode=pl.Buffered(1))

    out_padded = pl.pallas_call(
        _mlp_kernel,
        out_shape=jax.ShapeDtypeStruct((b_pad, out_dim), x.dtype),
        grid_spec=pltpu.PrefetchScalarGridSpec(
            num_scalar_prefetch=0,
            grid=grid,
            in_specs=[
                pl.BlockSpec((tb_eff, in_dim), lambda i: (i, 0)),   # batch tile
                const_spec(w1.shape), const_spec(b1.shape),
                const_spec(w2.shape), const_spec(b2.shape),
                const_spec(w3.shape), const_spec(b3.shape),
            ],
            out_specs=pl.BlockSpec((tb_eff, out_dim), lambda i: (i, 0)),
        ),
        compiler_params=pltpu.CompilerParams(
            dimension_semantics=("parallel",),
            vmem_limit_bytes=vmem_bytes,
        ),
    )(xp, w1, b1, w2, b2, w3, b3)

    # Slice away batch padding (padded rows hold tanh(bias) garbage).
    return out_padded[:B, :]


def init_params(key, input_dim, output_dim):
    """Deterministic init mirroring nn.Linear shapes (weights kept transposed)."""
    k1, k2, k3, k4, k5, k6 = jax.random.split(key, 6)

    def linear(kw, kb, fan_in, fan_out):
        bound = 1.0 / np.sqrt(fan_in)
        w = jax.random.uniform(kw, (fan_in, fan_out), jnp.float32, -bound, bound)
        b = jax.random.uniform(kb, (1, fan_out), jnp.float32, -bound, bound)
        return w, b

    w1, b1 = linear(k1, k2, input_dim, 512)
    w2, b2 = linear(k3, k4, 512, 256)
    w3, b3 = linear(k5, k6, 256, output_dim)
    return {"w1": w1, "b1": b1, "w2": w2, "b2": b2, "w3": w3, "b3": b3}


if __name__ == "__main__":
    key = jax.random.PRNGKey(0)
    input_dim, output_dim, batch = 32, 8, 16

    kx, kp = jax.random.split(key)
    x = jax.random.normal(kx, (batch, input_dim), jnp.float32)
    params = init_params(kp, input_dim, output_dim)

    # f32 compute == exact PyTorch numerics; on v6e/v7x pass
    # compute_dtype=jnp.bfloat16 to prepare_params for the faster bf16 path
    # (use a looser tolerance in that case).
    prepared = prepare_params(params, compute_dtype=jnp.float32)

    out = nonlinear_regression_forward(x, prepared)
    out = jax.block_until_ready(out)

    # Cross-check against a pure-JAX reference of the same forward pass.
    ref = x
    for wk, bk in (("w1", "b1"), ("w2", "b2"), ("w3", "b3")):
        ref = jnp.tanh(ref @ params[wk] + params[bk])
    np.testing.assert_allclose(np.asarray(out), np.asarray(ref), atol=1e-5, rtol=1e-5)

    print("KERNEL_OK")
</pallas_src>

<mosaic_0001>
module attributes {stable_mosaic.version = 11 : i64} {
  func.func @_mlp_kernel(%arg0: i32, %arg1: memref<16x32xf32, #tpu.memory_space<vmem>>, %arg2: memref<32x512xf32, #tpu.memory_space<vmem>>, %arg3: memref<1x512xf32, #tpu.memory_space<vmem>>, %arg4: memref<512x256xf32, #tpu.memory_space<vmem>>, %arg5: memref<1x256xf32, #tpu.memory_space<vmem>>, %arg6: memref<256x128xf32, #tpu.memory_space<vmem>>, %arg7: memref<1x128xf32, #tpu.memory_space<vmem>>, %arg8: memref<16x8xf32, #tpu.memory_space<vmem>>) attributes {dimension_semantics = [#tpu.dimension_semantics<parallel>], iteration_bounds = array<i64: 1>, scalar_prefetch = 0 : i64, scratch_operands = 0 : i64, tpu.core_type = #tpu.core_type<tc>, window_params = [{transform_indices = @transform_0, window_bounds = array<i64: 16, 32>}, {pipeline_mode = #tpu.pipeline_mode<synchronous>, transform_indices = @transform_1, window_bounds = array<i64: 32, 512>}, {pipeline_mode = #tpu.pipeline_mode<synchronous>, transform_indices = @transform_2, window_bounds = array<i64: 1, 512>}, {pipeline_mode = #tpu.pipeline_mode<synchronous>, transform_indices = @transform_3, window_bounds = array<i64: 512, 256>}, {pipeline_mode = #tpu.pipeline_mode<synchronous>, transform_indices = @transform_4, window_bounds = array<i64: 1, 256>}, {pipeline_mode = #tpu.pipeline_mode<synchronous>, transform_indices = @transform_5, window_bounds = array<i64: 256, 128>}, {pipeline_mode = #tpu.pipeline_mode<synchronous>, transform_indices = @transform_6, window_bounds = array<i64: 1, 128>}, {transform_indices = @transform_7, window_bounds = array<i64: 16, 8>}]} {
    %c0 = arith.constant 0 : index
    %c0_0 = arith.constant 0 : index
    %0 = vector.load %arg1[%c0, %c0_0] : memref<16x32xf32, #tpu.memory_space<vmem>>, vector<16x32xf32>
    %c0_1 = arith.constant 0 : index
    %c0_2 = arith.constant 0 : index
    %1 = vector.load %arg2[%c0_1, %c0_2] : memref<32x512xf32, #tpu.memory_space<vmem>>, vector<32x512xf32>
    %cst = arith.constant dense<0.000000e+00> : vector<16x512xf32>
    %2 = tpu.matmul %0, %1, %cst {dimension_numbers = #tpu.dot_dimension_numbers<[1], [0], [0], [1], [0, 0, 1, 1], [], []>} : vector<16x32xf32>, vector<32x512xf32>, vector<16x512xf32> -> vector<16x512xf32>
    %c0_3 = arith.constant 0 : index
    %c0_4 = arith.constant 0 : index
    %3 = vector.load %arg3[%c0_3, %c0_4] : memref<1x512xf32, #tpu.memory_space<vmem>>, vector<1x512xf32>
    %4 = vector.broadcast %3 : vector<1x512xf32> to vector<16x512xf32>
    %5 = arith.addf %2, %4 : vector<16x512xf32>
    %6 = math.tanh %5 : vector<16x512xf32>
    %c0_5 = arith.constant 0 : index
    %c0_6 = arith.constant 0 : index
    %7 = vector.load %arg4[%c0_5, %c0_6] : memref<512x256xf32, #tpu.memory_space<vmem>>, vector<512x256xf32>
    %cst_7 = arith.constant dense<0.000000e+00> : vector<16x256xf32>
    %8 = tpu.matmul %6, %7, %cst_7 {dimension_numbers = #tpu.dot_dimension_numbers<[1], [0], [0], [1], [0, 0, 1, 1], [], []>} : vector<16x512xf32>, vector<512x256xf32>, vector<16x256xf32> -> vector<16x256xf32>
    %c0_8 = arith.constant 0 : index
    %c0_9 = arith.constant 0 : index
    %9 = vector.load %arg5[%c0_8, %c0_9] : memref<1x256xf32, #tpu.memory_space<vmem>>, vector<1x256xf32>
    %10 = vector.broadcast %9 : vector<1x256xf32> to vector<16x256xf32>
    %11 = arith.addf %8, %10 : vector<16x256xf32>
    %12 = math.tanh %11 : vector<16x256xf32>
    %c0_10 = arith.constant 0 : index
    %c0_11 = arith.constant 0 : index
    %13 = vector.load %arg6[%c0_10, %c0_11] : memref<256x128xf32, #tpu.memory_space<vmem>>, vector<256x128xf32>
    %cst_12 = arith.constant dense<0.000000e+00> : vector<16x128xf32>
    %14 = tpu.matmul %12, %13, %cst_12 {dimension_numbers = #tpu.dot_dimension_numbers<[1], [0], [0], [1], [0, 0, 1, 1], [], []>} : vector<16x256xf32>, vector<256x128xf32>, vector<16x128xf32> -> vector<16x128xf32>
    %c0_13 = arith.constant 0 : index
    %c0_14 = arith.constant 0 : index
    %15 = vector.load %arg7[%c0_13, %c0_14] : memref<1x128xf32, #tpu.memory_space<vmem>>, vector<1x128xf32>
    %16 = vector.broadcast %15 : vector<1x128xf32> to vector<16x128xf32>
    %17 = arith.addf %14, %16 : vector<16x128xf32>
    %18 = math.tanh %17 : vector<16x128xf32>
    %19 = vector.extract_strided_slice %18 {offsets = [0, 0], sizes = [16, 8], strides = [1, 1]} : vector<16x128xf32> to vector<16x8xf32>
    %c0_15 = arith.constant 0 : index
    %c0_16 = arith.constant 0 : index
    %20 = vector.load %arg8[%c0_15, %c0_16] : memref<16x8xf32, #tpu.memory_space<vmem>>, vector<16x8xf32>
    tpu.vector_store %arg8[%c0_15, %c0_16], %19 {strides = array<i32>} : memref<16x8xf32, #tpu.memory_space<vmem>>, vector<16x8xf32>,
    return
  }
  func.func @transform_0(%arg0: i32) -> (i32, i32) {
    %c0_i32 = arith.constant 0 : i32
    %c0_i32_0 = arith.constant 0 : i32
    return %arg0, %c0_i32 : i32, i32
  }
  func.func @transform_1(%arg0: i32) -> (i32, i32) {
    %c0_i32 = arith.constant 0 : i32
    %c0_i32_0 = arith.constant 0 : i32
    %c0_i32_1 = arith.constant 0 : i32
    return %c0_i32, %c0_i32_0 : i32, i32
  }
  func.func @transform_2(%arg0: i32) -> (i32, i32) {
    %c0_i32 = arith.constant 0 : i32
    %c0_i32_0 = arith.constant 0 : i32
    %c0_i32_1 = arith.constant 0 : i32
    return %c0_i32, %c0_i32_0 : i32, i32
  }
  func.func @transform_3(%arg0: i32) -> (i32, i32) {
    %c0_i32 = arith.constant 0 : i32
    %c0_i32_0 = arith.constant 0 : i32
    %c0_i32_1 = arith.constant 0 : i32
    return %c0_i32, %c0_i32_0 : i32, i32
  }
  func.func @transform_4(%arg0: i32) -> (i32, i32) {
    %c0_i32 = arith.constant 0 : i32
    %c0_i32_0 = arith.constant 0 : i32
    %c0_i32_1 = arith.constant 0 : i32
    return %c0_i32, %c0_i32_0 : i32, i32
  }
  func.func @transform_5(%arg0: i32) -> (i32, i32) {
    %c0_i32 = arith.constant 0 : i32
    %c0_i32_0 = arith.constant 0 : i32
    %c0_i32_1 = arith.constant 0 : i32
    return %c0_i32, %c0_i32_0 : i32, i32
  }
  func.func @transform_6(%arg0: i32) -> (i32, i32) {
    %c0_i32 = arith.constant 0 : i32
    %c0_i32_0 = arith.constant 0 : i32
    %c0_i32_1 = arith.constant 0 : i32
    return %c0_i32, %c0_i32_0 : i32, i32
  }
  func.func @transform_7(%arg0: i32) -> (i32, i32) {
    %c0_i32 = arith.constant 0 : i32
    %c0_i32_0 = arith.constant 0 : i32
    return %arg0, %c0_i32 : i32, i32
  }
}

</mosaic_0001>

<bundles_post_ra>
// kernel: tpu_custom_call.1
= control target key start
LH: loop header
LB: loop body
LE: loop exit
PB: predicated region body
PF: predicated region fallthrough
CT: control target
= control target key end

     0   :  { %12 = vsyncpa [#allocation3], 0  ;;  %s1220_s0 = inlined_call_operand.hbm [shape: f32[16,32], index: 0, kind: input, shape index: {}]   ;;  %s1221_s1 = inlined_call_operand.hbm [shape: f32[32,512], index: 1, kind: input, shape index: {}]   ;;  %s1222_s2 = inlined_call_operand.vmem [shape: f32[1,512], index: 2, kind: input, shape index: {}]   ;;  %s1223_s3 = inlined_call_operand.hbm [shape: f32[512,256], index: 3, kind: input, shape index: {}]   ;;  %s1224_s4 = inlined_call_operand.vmem [shape: f32[1,256], index: 4, kind: input, shape index: {}]   ;;  %s1225_s5 = inlined_call_operand.hbm [shape: f32[256,128], index: 5, kind: input, shape index: {}]   ;;  %s1226_s6 = inlined_call_operand.vmem [shape: f32[1,128], index: 6, kind: input, shape index: {}]   ;;  %s1227_s7 = inlined_call_operand.vmem [shape: f32[16,8], index: 7, kind: output, shape index: {}]  }
   0x1   :  { %13 = vsyncpa [#allocation5], 0 }
   0x2   :  { %14 = vsyncpa [#allocation8], 0  ;;  %s1074_s24 = smov [#allocation4]   ;;  %s980_s28 = scalar_lea.hbm %s1221_s1, 2048 }
   0x3   :  { %s32_s25 = sshll.u32 %s1074_s24, 4  ;;  %p981_p0 = scmp.ne.s32.totalorder %s1221_s1, %s980_s28  ;;  %s33_s25 = int_to_ptr.vmem [resolvable:$true] %s32_s25 }
   0x4   :  { %p984_p1 = scmp.lt.u32.totalorder %s980_s28, %s1221_s1 }
   0x6   :  { %p986_p2 = pnand %p984_p1, %p981_p0 }
   0x8   :  { %989 = shalt.err (!%p986_p2)
}
   0x9   :  { %s990_s10 = scalar_lea.vmem %s33_s25, 2048  ;;  %p995_p4 = scmp.lt.s32.totalorder %s33_s25, %s33_s25 }
   0xa   :  { %p991_p3 = scmp.ne.s32.totalorder %s33_s25, %s990_s10  ;;  %p996_p5 = scmp.lt.s32.totalorder %s990_s10, %s990_s10 }
   0xc   :  { %p997_p6 = por %p996_p5, %p995_p4 }
   0xe   :  { %p998_p7 = pnand %p997_p6, %p991_p3 }
  0x10   :  { %1001 = shalt.err (!%p998_p7)
}
  0x11   :  { %s1075_s11 = smov 512   ;;  %s1076_s12 = smov 32  }
  0x12   :  { %38 = dma.hbm_to_vmem [thread:$0]  %s1221_s1, 2048, %s33_s25, [#allocation5], %s1075_s11, %s1075_s11, %s1076_s12  }
  0x13   :  { %s1077_s15 = smov [#allocation2]   ;;  %s1002_s19 = scalar_lea.hbm %s1220_s0, 256 }
  0x14   :  { %s20_s16 = sshll.u32 %s1077_s15, 4  ;;  %p1003_p8 = scmp.ne.s32.totalorder %s1220_s0, %s1002_s19  ;;  %s21_s16 = int_to_ptr.vmem [resolvable:$true] %s20_s16 }
  0x15   :  { %p1006_p9 = scmp.lt.u32.totalorder %s1002_s19, %s1220_s0 }
  0x17   :  { %p1008_p10 = pnand %p1006_p9, %p1003_p8 }
  0x19   :  { %1011 = shalt.err (!%p1008_p10)
}
  0x1a   :  { %s1012_s24 = scalar_lea.vmem %s21_s16, 256  ;;  %p1017_p12 = scmp.lt.s32.totalorder %s21_s16, %s21_s16 }
  0x1b   :  { %p1013_p11 = scmp.ne.s32.totalorder %s21_s16, %s1012_s24  ;;  %p1018_p13 = scmp.lt.s32.totalorder %s1012_s24, %s1012_s24 }
  0x1d   :  { %p1019_p0 = por %p1018_p13, %p1017_p12 }
  0x1f   :  { %p1020_p1 = pnand %p1019_p0, %p1013_p11 }
  0x21   :  { %1023 = shalt.err (!%p1020_p1)
}
  0x22   :  { %s1078_s1 = smov 128   ;;  %s1079_s25 = smov 8  }
  0x23   :  { %26 = dma.hbm_to_vmem [thread:$0]  %s1220_s0, 256, %s21_s16, [#allocation3], %s1078_s1, %s1078_s1, %s1079_s25  }
  0x24   :  { %s1080_s28 = smov [#allocation6]   ;;  %s1024_s9 = scalar_lea.hbm %s1223_s3, 16384 }
  0x25   :  { %s46_s29 = sshll.u32 %s1080_s28, 4  ;;  %p1025_p2 = scmp.ne.s32.totalorder %s1223_s3, %s1024_s9  ;;  %s47_s29 = int_to_ptr.vmem [resolvable:$true] %s46_s29 }
  0x26   :  { %p1028_p3 = scmp.lt.u32.totalorder %s1024_s9, %s1223_s3 }
  0x28   :  { %p1030_p4 = pnand %p1028_p3, %p1025_p2 }
  0x2a   :  { %1033 = shalt.err (!%p1030_p4)
}
  0x2b   :  { %s1034_s14 = scalar_lea.vmem %s47_s29, 16384  ;;  %p1039_p6 = scmp.lt.s32.totalorder %s47_s29, %s47_s29 }
  0x2c   :  { %p1035_p5 = scmp.ne.s32.totalorder %s47_s29, %s1034_s14  ;;  %p1040_p7 = scmp.lt.s32.totalorder %s1034_s14, %s1034_s14 }
  0x2e   :  { %p1041_p8 = por %p1040_p7, %p1039_p6 }
  0x30   :  { %p1042_p9 = pnand %p1041_p8, %p1035_p5 }
  0x32   :  { %1045 = shalt.err (!%p1042_p9)
}
  0x33   :  { %s1081_s0 = smov 256   ;;  %s1082_s15 = smov 16  }
  0x34   :  { %52 = dma.hbm_to_vmem [thread:$0]  %s1223_s3, 16384, %s47_s29, [#allocation5], %s1081_s0, %s1081_s0, %s1082_s15  }
  0x35   :  { %s1083_s18 = smov [#allocation7]   ;;  %s1046_s22 = scalar_lea.hbm %s1225_s5, 4096 }
  0x36   :  { %s60_s19 = sshll.u32 %s1083_s18, 4  ;;  %p1047_p10 = scmp.ne.s32.totalorder %s1225_s5, %s1046_s22  ;;  %s61_s19 = int_to_ptr.vmem [resolvable:$true] %s60_s19 }
  0x37   :  { %p1050_p11 = scmp.lt.u32.totalorder %s1046_s22, %s1225_s5 }
  0x39   :  { %p1052_p12 = pnand %p1050_p11, %p1047_p10 }
  0x3b   :  { %1055 = shalt.err (!%p1052_p12)
}
  0x3c   :  { %s1056_s28 = scalar_lea.vmem %s61_s19, 4096  ;;  %p1061_p0 = scmp.lt.s32.totalorder %s61_s19, %s61_s19 }
  0x3d   :  { %p1057_p13 = scmp.ne.s32.totalorder %s61_s19, %s1056_s28  ;;  %p1062_p1 = scmp.lt.s32.totalorder %s1056_s28, %s1056_s28 }
  0x3f   :  { %p1063_p2 = por %p1062_p1, %p1061_p0 }
  0x41   :  { %p1064_p3 = pnand %p1063_p2, %p1057_p13 }
  0x43   :  { %1067 = shalt.err (!%p1064_p3)
}
  0x44   :  { %66 = dma.hbm_to_vmem [thread:$0]  %s1225_s5, 4096, %s61_s19, [#allocation8], %s1078_s1, %s1078_s1, %s1079_s25  }
  0x45   :  { %1068 = dma.done.wait [#allocation3], 256  }
  0x46   :  { %1069 = vsyncadd [#allocation3], 4294967040 }
  0x47   :  { %1070 = dma.done.wait [#allocation5], 18432  }
  0x48   :  { %1071 = vsyncadd [#allocation5], 4294948864 }
  0x49   :  { %1072 = dma.done.wait [#allocation8], 4096  }
  0x4a   :  { %1073 = vsyncadd [#allocation8], 4294963200  ;;  %v1084_v0 = vmov 0.0   ;;  %v84_v1 = vld [vmem:[#allocation4 + $0x8] sm:$0xff]  ;;  %v83_v3 = vld [vmem:[#allocation4] sm:$0xff]  ;;  %vm121_vm0 = vcmask 261120  }
  0x4b   :  { %192 = vmatprep.mubr.f32.mxu0 %v1084_v0  ;;  %v88_v2 = vld [vmem:[#allocation4 + $0x28] sm:$0xff]  ;;  %v87_v5 = vld [vmem:[#allocation4 + $0x20] sm:$0xff]  ;;  %v86_v12 = vld [vmem:[#allocation4 + $0x18] sm:$0xff]  ;;  %vm704_vm1 = vcmask 64512  }
  0x4c   :  { %v757_v4 = vpack.c.bf16 %v88_v2, %v84_v1  ;;  %v92_v6 = vld [vmem:[#allocation4 + $0x48] sm:$0xff]  ;;  %v759_v8 = vpack.c.bf16 %v87_v5, %v83_v3  ;;  %v91_v10 = vld [vmem:[#allocation4 + $0x40] sm:$0xff]  ;;  %v90_v13 = vld [vmem:[#allocation4 + $0x38] sm:$0xff] }
  0x4d   :  { %v96_v7 = vld [vmem:[#allocation4 + $0x68] sm:$0xff]  ;;  %v95_v11 = vld [vmem:[#allocation4 + $0x60] sm:$0xff]  ;;  %v85_v15 = vld [vmem:[#allocation4 + $0x10] sm:$0xff]  ;;  %v765_v16 = vpack.c.bf16 %v90_v13, %v86_v12 }
  0x4e   :  { %v761_v9 = vpack.c.bf16 %v96_v7, %v92_v6  ;;  %758 = vmatprep.subr.bf16.mxu0 %v757_v4  ;;  %v763_v14 = vpack.c.bf16 %v95_v11, %v91_v10  ;;  %v89_v17 = vld [vmem:[#allocation4 + $0x30] sm:$0xff]  ;;  %v94_v18 = vld [vmem:[#allocation4 + $0x58] sm:$0xff]  ;;  %v291_v21 = vld [vmem:[#allocation6 + $0x8] sm:$0xff] }
  0x4f   :  { %760 = vmatpush1.bf16.msra.mxu0 %v759_v8  ;;  %v98_v19 = vld [vmem:[#allocation4 + $0x78] sm:$0xff]  ;;  %v1180_v20 = vld [vmem:[#allocation2] sm:$0xff]  ;;  %v290_v23 = vld [vmem:[#allocation6] sm:$0xff]  ;;  %v767_v28 = vpack.c.bf16 %v89_v17, %v85_v15 }
  0x50   :  { %762 = vmatprep.subr.bf16.mxu0 %v761_v9  ;;  %v293_v22 = vld [vmem:[#allocation6 + $0x18] sm:$0xff]  ;;  %v292_v25 = vld [vmem:[#allocation6 + $0x10] sm:$0xff]  ;;  %v295_v26 = vld [vmem:[#allocation6 + $0x28] sm:$0xff]  ;;  %v769_v34 = vpack.c.bf16 %v98_v19, %v94_v18 }
  0x51   :  { %v773_v24 = vpack.c.bf16 %v293_v22, %v291_v21  ;;  %v297_v27 = vld [vmem:[#allocation6 + $0x38] sm:$0xff]  ;;  %v775_v29 = vpack.c.bf16 %v292_v25, %v290_v23  ;;  %v294_v31 = vld [vmem:[#allocation6 + $0x20] sm:$0xff]  ;;  %v296_v32 = vld [vmem:[#allocation6 + $0x30] sm:$0xff] }
  0x52   :  { %v777_v30 = vpack.c.bf16 %v297_v27, %v295_v26  ;;  %v299_v33 = vld [vmem:[#allocation6 + $0x48] sm:$0xff]  ;;  %v93_v35 = vld [vmem:[#allocation4 + $0x50] sm:$0xff]  ;;  %v301_v37 = vld [vmem:[#allocation6 + $0x58] sm:$0xff]  ;;  %v779_v38 = vpack.c.bf16 %v296_v32, %v294_v31 }
  0x53   :  { %764 = vmatpush1.bf16.msra.mxu0 %v763_v14  ;;  %v97_v36 = vld [vmem:[#allocation4 + $0x70] sm:$0xff]  ;;  %774 = vmatprep.subr.bf16.mxu1 %v773_v24  ;;  %v355_v39 = vld [vmem:[#allocation6 + $0x208] sm:$0xff]  ;;  %v357_v40 = vld [vmem:[#allocation6 + $0x218] sm:$0xff]  ;;  %v781_v41 = vpack.c.bf16 %v301_v37, %v299_v33 }
  0x54   :  { %766 = vmatprep.subr.bf16.mxu0 %v765_v16  ;;  %776 = vmatpush1.bf16.msra.mxu1 %v775_v29  ;;  %v298_v42 = vld [vmem:[#allocation6 + $0x40] sm:$0xff]  ;;  %v300_v43 = vld [vmem:[#allocation6 + $0x50] sm:$0xff]  ;;  %v82_v44 = vld [vmem:[#allocation2 + $0x8] sm:$0xff]  ;;  %v771_v45 = vpack.c.bf16 %v97_v36, %v93_v35  ;;  %v837_v48 = vpack.c.bf16 %v357_v40, %v355_v39 }
  0x55   :  { %778 = vmatprep.subr.bf16.mxu1 %v777_v30  ;;  %v303_v46 = vld [vmem:[#allocation6 + $0x68] sm:$0xff]  ;;  %v305_v47 = vld [vmem:[#allocation6 + $0x78] sm:$0xff]  ;;  %v354_v49 = vld [vmem:[#allocation6 + $0x200] sm:$0xff]  ;;  %v783_v51 = vpack.c.bf16 %v300_v43, %v298_v42 }
  0x56   :  { %714 = vmatmul.mubr.msk.f32.vlgmr.msra.gmra.mrb[0].mxu0 %vm121_vm0, %v1180_v20  ;;  %v356_v50 = vld [vmem:[#allocation6 + $0x210] sm:$0xff]  ;;  %v359_v52 = vld [vmem:[#allocation6 + $0x228] sm:$0xff]  ;;  %v361_v53 = vld [vmem:[#allocation6 + $0x238] sm:$0xff]  ;;  %v785_v54 = vpack.c.bf16 %v305_v47, %v303_v46 }
  0x57   :  { %768 = vmatpush1.bf16.msra.mxu0 %v767_v28  ;;  %198 = vmatprep.mubr.f32.mxu0 %v1084_v0  ;;  %v302_v55 = vld [vmem:[#allocation6 + $0x60] sm:$0xff]  ;;  %v304_v56 = vld [vmem:[#allocation6 + $0x70] sm:$0xff]  ;;  %v839_v57 = vpack.c.bf16 %v356_v50, %v354_v49  ;;  %v307_v58 = vld [vmem:[#allocation6 + $0x88] sm:$0xff]  ;;  %v841_v60 = vpack.c.bf16 %v361_v53, %v359_v52 }
  0x58   :  { %770 = vmatprep.subr.bf16.mxu0 %v769_v34  ;;  %780 = vmatpush1.bf16.msra.mxu1 %v779_v38  ;;  %v309_v59 = vld [vmem:[#allocation6 + $0x98] sm:$0xff]  ;;  %v358_v61 = vld [vmem:[#allocation6 + $0x220] sm:$0xff]  ;;  %v360_v62 = vld [vmem:[#allocation6 + $0x230] sm:$0xff]  ;;  %v787_v63 = vpack.c.bf16 %v304_v56, %v302_v55 }
  0x59   :  { %782 = vmatprep.subr.bf16.mxu1 %v781_v41  ;;  %v363_v1 = vld [vmem:[#allocation6 + $0x248] sm:$0xff]  ;;  %v365_v2 = vld [vmem:[#allocation6 + $0x258] sm:$0xff]  ;;  %v789_v3 = vpack.c.bf16 %v309_v59, %v307_v58  ;;  %v306_v4 = vld [vmem:[#allocation6 + $0x80] sm:$0xff]  ;;  %v843_v6 = vpack.c.bf16 %v360_v62, %v358_v61 }
  0x5a   :  { %715 = vmatmul.mubr.msk.f32.gmra.mrb[2].mxu0 %vm121_vm0, %v82_v44  ;;  %v308_v5 = vld [vmem:[#allocation6 + $0x90] sm:$0xff]  ;;  %v311_v7 = vld [vmem:[#allocation6 + $0xa8] sm:$0xff]  ;;  %v313_v8 = vld [vmem:[#allocation6 + $0xb8] sm:$0xff]  ;;  %v845_v9 = vpack.c.bf16 %v365_v2, %v363_v1 }
  0x5b   :  { %772 = vmatpush1.bf16.msra.mxu0 %v771_v45  ;;  %269 = vmatprep.mubr.f32.mxu0 %v1084_v0  ;;  %v362_v10 = vld [vmem:[#allocation6 + $0x240] sm:$0xff]  ;;  %v364_v11 = vld [vmem:[#allocation6 + $0x250] sm:$0xff]  ;;  %v791_v12 = vpack.c.bf16 %v308_v5, %v306_v4  ;;  %v367_v13 = vld [vmem:[#allocation6 + $0x268] sm:$0xff]  ;;  %v793_v15 = vpack.c.bf16 %v313_v8, %v311_v7 }
  0x5c   :  { %838 = vmatprep.subr.bf16.mxu0 %v837_v48  ;;  %784 = vmatpush1.bf16.msra.mxu1 %v783_v51  ;;  %v369_v14 = vld [vmem:[#allocation6 + $0x278] sm:$0xff]  ;;  %v310_v16 = vld [vmem:[#allocation6 + $0xa0] sm:$0xff]  ;;  %v312_v17 = vld [vmem:[#allocation6 + $0xb0] sm:$0xff] }
  0x5d   :  { %786 = vmatprep.subr.bf16.mxu1 %v785_v54  ;;  %v315_v18 = vld [vmem:[#allocation6 + $0xc8] sm:$0xff]  ;;  %v317_v19 = vld [vmem:[#allocation6 + $0xd8] sm:$0xff]  ;;  %v366_v21 = vld [vmem:[#allocation6 + $0x260] sm:$0xff]  ;;  %v795_v23 = vpack.c.bf16 %v312_v17, %v310_v16 }
  0x5e   :  { %716 = vmatmul.mubr.msk.f32.vlgmr.msra.gmra.mrb[4].mxu0 %vm121_vm0, %v1180_v20  ;;  %v849_v20 = vpack.c.bf16 %v369_v14, %v367_v13  ;;  %v368_v22 = vld [vmem:[#allocation6 + $0x270] sm:$0xff]  ;;  %v371_v24 = vld [vmem:[#allocation6 + $0x288] sm:$0xff]  ;;  %v373_v25 = vld [vmem:[#allocation6 + $0x298] sm:$0xff]  ;;  %v797_v26 = vpack.c.bf16 %v317_v19, %v315_v18 }
  0x5f   :  { %275 = vmatprep.mubr.f32.mxu0 %v1084_v0  ;;  %840 = vmatpush1.bf16.msra.mxu0 %v839_v57  ;;  %v847_v0 = vpack.c.bf16 %v364_v11, %v362_v10  ;;  %v314_v27 = vld [vmem:[#allocation6 + $0xc0] sm:$0xff]  ;;  %v316_v28 = vld [vmem:[#allocation6 + $0xd0] sm:$0xff]  ;;  %v851_v29 = vpack.c.bf16 %v368_v22, %v366_v21  ;;  %v319_v30 = vld [vmem:[#allocation6 + $0xe8] sm:$0xff]  ;;  %v853_v32 = vpack.c.bf16 %v373_v25, %v371_v24 }
  0x60   :  { %842 = vmatprep.subr.bf16.mxu0 %v841_v60  ;;  %788 = vmatpush1.bf16.msra.mxu1 %v787_v63  ;;  %v321_v31 = vld [vmem:[#allocation6 + $0xf8] sm:$0xff]  ;;  %v370_v33 = vld [vmem:[#allocation6 + $0x280] sm:$0xff]  ;;  %v372_v34 = vld [vmem:[#allocation6 + $0x290] sm:$0xff]  ;;  %v799_v35 = vpack.c.bf16 %v316_v28, %v314_v27 }
  0x61   :  { %790 = vmatprep.subr.bf16.mxu1 %v789_v3  ;;  %v375_v36 = vld [vmem:[#allocation6 + $0x2a8] sm:$0xff]  ;;  %v377_v37 = vld [vmem:[#allocation6 + $0x2b8] sm:$0xff]  ;;  %v801_v38 = vpack.c.bf16 %v321_v31, %v319_v30  ;;  %v318_v39 = vld [vmem:[#allocation6 + $0xe0] sm:$0xff]  ;;  %v855_v41 = vpack.c.bf16 %v372_v34, %v370_v33 }
  0x62   :  { %717 = vmatmul.mubr.msk.f32.gmra.mrb[6].mxu0 %vm121_vm0, %v82_v44  ;;  %v320_v40 = vld [vmem:[#allocation6 + $0xf0] sm:$0xff]  ;;  %v323_v42 = vld [vmem:[#allocation6 + $0x108] sm:$0xff]  ;;  %v325_v43 = vld [vmem:[#allocation6 + $0x118] sm:$0xff]  ;;  %v857_v44 = vpack.c.bf16 %v377_v37, %v375_v36 }
  0x63   :  { %844 = vmatpush1.bf16.msra.mxu0 %v843_v6  ;;  %v374_v45 = vld [vmem:[#allocation6 + $0x2a0] sm:$0xff]  ;;  %v376_v46 = vld [vmem:[#allocation6 + $0x2b0] sm:$0xff]  ;;  %v803_v47 = vpack.c.bf16 %v320_v40, %v318_v39  ;;  %v379_v48 = vld [vmem:[#allocation6 + $0x2c8] sm:$0xff]  ;;  %v805_v50 = vpack.c.bf16 %v325_v43, %v323_v42 }
  0x64   :  { %846 = vmatprep.subr.bf16.mxu0 %v845_v9  ;;  %792 = vmatpush1.bf16.msra.mxu1 %v791_v12  ;;  %v381_v49 = vld [vmem:[#allocation6 + $0x2d8] sm:$0xff]  ;;  %v322_v51 = vld [vmem:[#allocation6 + $0x100] sm:$0xff]  ;;  %v324_v52 = vld [vmem:[#allocation6 + $0x110] sm:$0xff]  ;;  %v859_v53 = vpack.c.bf16 %v376_v46, %v374_v45 }
  0x65   :  { %794 = vmatprep.subr.bf16.mxu1 %v793_v15  ;;  %v327_v54 = vld [vmem:[#allocation6 + $0x128] sm:$0xff]  ;;  %v329_v55 = vld [vmem:[#allocation6 + $0x138] sm:$0xff]  ;;  %v861_v56 = vpack.c.bf16 %v381_v49, %v379_v48  ;;  %v378_v57 = vld [vmem:[#allocation6 + $0x2c0] sm:$0xff]  ;;  %v807_v59 = vpack.c.bf16 %v324_v52, %v322_v51 }
  0x66   :  { %v380_v58 = vld [vmem:[#allocation6 + $0x2d0] sm:$0xff]  ;;  %v383_v60 = vld [vmem:[#allocation6 + $0x2e8] sm:$0xff]  ;;  %v385_v61 = vld [vmem:[#allocation6 + $0x2f8] sm:$0xff]  ;;  %v809_v62 = vpack.c.bf16 %v329_v55, %v327_v54 }
  0x67   :  { %848 = vmatpush1.bf16.msra.mxu0 %v847_v0  ;;  %v326_v63 = vld [vmem:[#allocation6 + $0x120] sm:$0xff]  ;;  %v328_v1 = vld [vmem:[#allocation6 + $0x130] sm:$0xff]  ;;  %v863_v2 = vpack.c.bf16 %v380_v58, %v378_v57  ;;  %v331_v3 = vld [vmem:[#allocation6 + $0x148] sm:$0xff]  ;;  %v865_v5 = vpack.c.bf16 %v385_v61, %v383_v60 }
  0x68   :  { %850 = vmatprep.subr.bf16.mxu0 %v849_v20  ;;  %796 = vmatpush1.bf16.msra.mxu1 %v795_v23  ;;  %v333_v4 = vld [vmem:[#allocation6 + $0x158] sm:$0xff]  ;;  %v382_v6 = vld [vmem:[#allocation6 + $0x2e0] sm:$0xff]  ;;  %v384_v7 = vld [vmem:[#allocation6 + $0x2f0] sm:$0xff]  ;;  %v811_v8 = vpack.c.bf16 %v328_v1, %v326_v63 }
  0x69   :  { %798 = vmatprep.subr.bf16.mxu1 %v797_v26  ;;  %v387_v9 = vld [vmem:[#allocation6 + $0x308] sm:$0xff]  ;;  %v389_v10 = vld [vmem:[#allocation6 + $0x318] sm:$0xff]  ;;  %v813_v11 = vpack.c.bf16 %v333_v4, %v331_v3  ;;  %v330_v12 = vld [vmem:[#allocation6 + $0x140] sm:$0xff]  ;;  %v867_v14 = vpack.c.bf16 %v384_v7, %v382_v6 }
  0x6a   :  { %v332_v13 = vld [vmem:[#allocation6 + $0x150] sm:$0xff]  ;;  %v335_v15 = vld [vmem:[#allocation6 + $0x168] sm:$0xff]  ;;  %v337_v16 = vld [vmem:[#allocation6 + $0x178] sm:$0xff]  ;;  %v869_v17 = vpack.c.bf16 %v389_v10, %v387_v9 }
  0x6b   :  { %852 = vmatpush1.bf16.msra.mxu0 %v851_v29  ;;  %v386_v0 = vld [vmem:[#allocation6 + $0x300] sm:$0xff]  ;;  %v388_v18 = vld [vmem:[#allocation6 + $0x310] sm:$0xff]  ;;  %v815_v19 = vpack.c.bf16 %v332_v13, %v330_v12  ;;  %v391_v20 = vld [vmem:[#allocation6 + $0x328] sm:$0xff]  ;;  %v817_v22 = vpack.c.bf16 %v337_v16, %v335_v15 }
  0x6c   :  { %854 = vmatprep.subr.bf16.mxu0 %v853_v32  ;;  %800 = vmatpush1.bf16.msra.mxu1 %v799_v35  ;;  %v393_v21 = vld [vmem:[#allocation6 + $0x338] sm:$0xff]  ;;  %v334_v23 = vld [vmem:[#allocation6 + $0x160] sm:$0xff]  ;;  %v336_v24 = vld [vmem:[#allocation6 + $0x170] sm:$0xff]  ;;  %v871_v25 = vpack.c.bf16 %v388_v18, %v386_v0 }
  0x6d   :  { %802 = vmatprep.subr.bf16.mxu1 %v801_v38  ;;  %v873_v26 = vpack.c.bf16 %v393_v21, %v391_v20  ;;  %v390_v27 = vld [vmem:[#allocation6 + $0x320] sm:$0xff]  ;;  %v392_v28 = vld [vmem:[#allocation6 + $0x330] sm:$0xff]  ;;  %v819_v29 = vpack.c.bf16 %v336_v24, %v334_v23  ;;  %v339_v31 = vld [vmem:[#allocation6 + $0x188] sm:$0xff] }
  0x6e   :  { %v875_v30 = vpack.c.bf16 %v392_v28, %v390_v27  ;;  %v341_v32 = vld [vmem:[#allocation6 + $0x198] sm:$0xff]  ;;  %v395_v33 = vld [vmem:[#allocation6 + $0x348] sm:$0xff]  ;;  %v338_v36 = vld [vmem:[#allocation6 + $0x180] sm:$0xff] }
  0x6f   :  { %856 = vmatpush1.bf16.msra.mxu0 %v855_v41  ;;  %v821_v34 = vpack.c.bf16 %v341_v32, %v339_v31  ;;  %v397_v35 = vld [vmem:[#allocation6 + $0x358] sm:$0xff]  ;;  %v340_v37 = vld [vmem:[#allocation6 + $0x190] sm:$0xff]  ;;  %v394_v40 = vld [vmem:[#allocation6 + $0x340] sm:$0xff] }
  0x70   :  { %858 = vmatprep.subr.bf16.mxu0 %v857_v44  ;;  %804 = vmatpush1.bf16.msra.mxu1 %v803_v47  ;;  %v877_v38 = vpack.c.bf16 %v397_v35, %v395_v33  ;;  %v823_v39 = vpack.c.bf16 %v340_v37, %v338_v36  ;;  %v396_v41 = vld [vmem:[#allocation6 + $0x350] sm:$0xff]  ;;  %v343_v43 = vld [vmem:[#allocation6 + $0x1a8] sm:$0xff]  ;;  %v345_v44 = vld [vmem:[#allocation6 + $0x1b8] sm:$0xff] }
  0x71   :  { %806 = vmatprep.subr.bf16.mxu1 %v805_v50  ;;  %v879_v42 = vpack.c.bf16 %v396_v41, %v394_v40  ;;  %v399_v45 = vld [vmem:[#allocation6 + $0x368] sm:$0xff]  ;;  %v825_v46 = vpack.c.bf16 %v345_v44, %v343_v43  ;;  %v401_v47 = vld [vmem:[#allocation6 + $0x378] sm:$0xff]  ;;  %v342_v48 = vld [vmem:[#allocation6 + $0x1a0] sm:$0xff] }
  0x72   :  { %v344_v49 = vld [vmem:[#allocation6 + $0x1b0] sm:$0xff]  ;;  %v881_v50 = vpack.c.bf16 %v401_v47, %v399_v45  ;;  %v398_v52 = vld [vmem:[#allocation6 + $0x360] sm:$0xff]  ;;  %v347_v55 = vld [vmem:[#allocation6 + $0x1c8] sm:$0xff] }
  0x73   :  { %860 = vmatpush1.bf16.msra.mxu0 %v859_v53  ;;  %v827_v51 = vpack.c.bf16 %v344_v49, %v342_v48  ;;  %v400_v53 = vld [vmem:[#allocation6 + $0x370] sm:$0xff]  ;;  %v403_v57 = vld [vmem:[#allocation6 + $0x388] sm:$0xff]  ;;  %v346_v60 = vld [vmem:[#allocation6 + $0x1c0] sm:$0xff] }
  0x74   :  { %862 = vmatprep.subr.bf16.mxu0 %v861_v56  ;;  %808 = vmatpush1.bf16.msra.mxu1 %v807_v59  ;;  %v883_v54 = vpack.c.bf16 %v400_v53, %v398_v52  ;;  %v349_v56 = vld [vmem:[#allocation6 + $0x1d8] sm:$0xff]  ;;  %v348_v61 = vld [vmem:[#allocation6 + $0x1d0] sm:$0xff]  ;;  %v402_v1 = vld [vmem:[#allocation6 + $0x380] sm:$0xff] }
  0x75   :  { %810 = vmatprep.subr.bf16.mxu1 %v809_v62  ;;  %v829_v58 = vpack.c.bf16 %v349_v56, %v347_v55  ;;  %v405_v59 = vld [vmem:[#allocation6 + $0x398] sm:$0xff]  ;;  %v831_v63 = vpack.c.bf16 %v348_v61, %v346_v60  ;;  %v351_v4 = vld [vmem:[#allocation6 + $0x1e8] sm:$0xff]  ;;  %v350_v9 = vld [vmem:[#allocation6 + $0x1e0] sm:$0xff] }
  0x76   :  { %v885_v62 = vpack.c.bf16 %v405_v59, %v403_v57  ;;  %v407_v6 = vld [vmem:[#allocation6 + $0x3a8] sm:$0xff]  ;;  %v352_v10 = vld [vmem:[#allocation6 + $0x1f0] sm:$0xff]  ;;  %v406_v13 = vld [vmem:[#allocation6 + $0x3a0] sm:$0xff] }
  0x77   :  { %864 = vmatpush1.bf16.msra.mxu0 %v863_v2  ;;  %v404_v2 = vld [vmem:[#allocation6 + $0x390] sm:$0xff]  ;;  %v835_v12 = vpack.c.bf16 %v352_v10, %v350_v9  ;;  %v411_v16 = vld [vmem:[#allocation6 + $0x3c8] sm:$0xff]  ;;  %v410_v18 = vld [vmem:[#allocation6 + $0x3c0] sm:$0xff] }
  0x78   :  { %866 = vmatprep.subr.bf16.mxu0 %v865_v5  ;;  %812 = vmatpush1.bf16.msra.mxu1 %v811_v8  ;;  %v887_v3 = vpack.c.bf16 %v404_v2, %v402_v1  ;;  %v353_v5 = vld [vmem:[#allocation6 + $0x1f8] sm:$0xff]  ;;  %v415_v21 = vld [vmem:[#allocation6 + $0x3e8] sm:$0xff]  ;;  %v414_v24 = vld [vmem:[#allocation6 + $0x3e0] sm:$0xff] }
  0x79   :  { %814 = vmatprep.subr.bf16.mxu1 %v813_v11  ;;  %v833_v7 = vpack.c.bf16 %v353_v5, %v351_v4  ;;  %v409_v8 = vld [vmem:[#allocation6 + $0x3b8] sm:$0xff]  ;;  %v604_v27 = vld [vmem:[#allocation7 + $0x80] sm:$0xff]  ;;  %v605_v28 = vld [vmem:[#allocation7 + $0x88] sm:$0xff] }
  0x7a   :  { %v889_v11 = vpack.c.bf16 %v409_v8, %v407_v6  ;;  %v99_v33 = vld [vmem:[%s1222_s2] sm:$0xf]  ;;  %v588_v53 = vld [vmem:[#allocation7] sm:$0xff]  ;;  %v607_v56 = vld [vmem:[#allocation7 + $0x98] sm:$0xff] }
  0x7b   :  { %868 = vmatpush1.bf16.msra.mxu0 %v867_v14  ;;  %v408_v14 = vld [vmem:[#allocation6 + $0x3b0] sm:$0xff]  ;;  %v591_v2 = vld [vmem:[#allocation7 + $0x18] sm:$0xff] }
  0x7c   :  { %870 = vmatprep.subr.bf16.mxu0 %v869_v17  ;;  %816 = vmatpush1.bf16.msra.mxu1 %v815_v19  ;;  %v891_v15 = vpack.c.bf16 %v408_v14, %v406_v13  ;;  %v413_v17 = vld [vmem:[#allocation6 + $0x3d8] sm:$0xff]  ;;  %v412_v19 = vld [vmem:[#allocation6 + $0x3d0] sm:$0xff]  ;;  %v592_v14 = vld [vmem:[#allocation7 + $0x20] sm:$0xff] }
  0x7d   :  { %818 = vmatprep.subr.bf16.mxu1 %v817_v22  ;;  %v893_v0 = vpack.c.bf16 %v413_v17, %v411_v16  ;;  %v895_v20 = vpack.c.bf16 %v412_v19, %v410_v18  ;;  %v417_v22 = vld [vmem:[#allocation6 + $0x3f8] sm:$0xff]  ;;  %v606_v55 = vld [vmem:[#allocation7 + $0x90] sm:$0xff] }
  0x7e   :  { %v897_v23 = vpack.c.bf16 %v417_v22, %v415_v21  ;;  %v590_v1 = vld [vmem:[#allocation7 + $0x10] sm:$0xff]  ;;  %v612_v22 = vld [vmem:[#allocation7 + $0xc0] sm:$0xff] }
  0x7f   :  { %872 = vmatpush1.bf16.msra.mxu0 %v871_v25  ;;  %v416_v25 = vld [vmem:[#allocation6 + $0x3f0] sm:$0xff]  ;;  %v907_v4 = vpack.c.bf16 %v591_v2, %v590_v1 }
  0x80   :  { %874 = vmatprep.subr.bf16.mxu0 %v873_v26  ;;  %820 = vmatpush1.bf16.msra.mxu1 %v819_v29  ;;  %v899_v26 = vpack.c.bf16 %v416_v25, %v414_v24  ;;  %v901_v29 = vpack.c.bf16 %v605_v28, %v604_v27  ;;  %v610_v17 = vld [vmem:[#allocation7 + $0xb0] sm:$0xff]  ;;  %v596_v25 = vld [vmem:[#allocation7 + $0x40] sm:$0xff] }
  0x81   :  { %822 = vmatprep.subr.bf16.mxu1 %v821_v34  ;;  %v594_v19 = vld [vmem:[#allocation7 + $0x30] sm:$0xff] }
  0x82   :  { %v614_v28 = vld [vmem:[#allocation7 + $0xd0] sm:$0xff] }
  0x83   :  { %876 = vmatpush1.bf16.msra.mxu0 %v875_v30  ;;  %v101_v30 = vlaneseq }
  0x84   :  { %878 = vmatprep.subr.bf16.mxu0 %v877_v38  ;;  %824 = vmatpush1.bf16.msra.mxu1 %v823_v39 }
  0x85   :  { %826 = vmatprep.subr.bf16.mxu1 %v825_v46  ;;  %v1191_v31 = vshrl.u32 %v101_v30, 7 }
  0x87   :  { %880 = vmatpush1.bf16.msra.mxu0 %v879_v42  ;;  %v103_v32 = vsub.s32 0, %v1191_v31  ;;  %v107_v34 = vsub.s32 1, %v1191_v31  ;;  %v111_v40 = vsub.s32 2, %v1191_v31  ;;  %v115_v42 = vsub.s32 3, %v1191_v31 }
  0x88   :  { %882 = vmatprep.subr.bf16.mxu0 %v881_v50  ;;  %828 = vmatpush1.bf16.msra.mxu1 %v827_v51 }
  0x89   :  { %830 = vmatprep.subr.bf16.mxu1 %v829_v58  ;;  %v104_v35 = vrot.slane %v99_v33, %v103_v32  ;;  %v108_v36 = vrot.slane %v99_v33, %v107_v34  ;;  %v112_v46 = vrot.slane %v99_v33, %v111_v40  ;;  %v116_v48 = vrot.slane %v99_v33, %v115_v42  ;;  %v598_v33 = vld [vmem:[#allocation7 + $0x50] sm:$0xff]  ;;  %v600_v40 = vld [vmem:[#allocation7 + $0x60] sm:$0xff] }
  0x8b   :  { %884 = vmatpush1.bf16.msra.mxu0 %v883_v54  ;;  %v589_v54 = vld [vmem:[#allocation7 + $0x8] sm:$0xff] }
  0x8c   :  { %886 = vmatprep.subr.bf16.mxu0 %v885_v62  ;;  %832 = vmatpush1.bf16.msra.mxu1 %v831_v63  ;;  %v903_v60 = vpack.c.bf16 %v589_v54, %v588_v53  ;;  %v905_v63 = vpack.c.bf16 %v607_v56, %v606_v55 }
  0x8d   :  { %834 = vmatprep.subr.bf16.mxu1 %v833_v7 }
  0x8f   :  { %888 = vmatpush1.bf16.msra.mxu0 %v887_v3 }
  0x90   :  { %890 = vmatprep.subr.bf16.mxu0 %v889_v11  ;;  %836 = vmatpush1.bf16.msra.mxu1 %v835_v12  ;;  %v608_v11 = vld [vmem:[#allocation7 + $0xa0] sm:$0xff]  ;;  %v609_v12 = vld [vmem:[#allocation7 + $0xa8] sm:$0xff] }
  0x91   :  { %902 = vmatprep.subr.bf16.mxu1 %v901_v29  ;;  %v909_v13 = vpack.c.bf16 %v609_v12, %v608_v11  ;;  %v615_v29 = vld [vmem:[#allocation7 + $0xd8] sm:$0xff] }
  0x92   :  { %v921_v30 = vpack.c.bf16 %v615_v29, %v614_v28 }
  0x93   :  { %892 = vmatpush1.bf16.msra.mxu0 %v891_v15  ;;  %v593_v15 = vld [vmem:[#allocation7 + $0x28] sm:$0xff] }
  0x94   :  { %894 = vmatprep.subr.bf16.mxu0 %v893_v0  ;;  %v911_v16 = vpack.c.bf16 %v593_v15, %v592_v14  ;;  %v611_v0 = vld [vmem:[#allocation7 + $0xb8] sm:$0xff] }
  0x95   :  { %v913_v18 = vpack.c.bf16 %v611_v0, %v610_v17 }
  0x97   :  { %896 = vmatpush1.bf16.msra.mxu0 %v895_v20  ;;  %v595_v20 = vld [vmem:[#allocation7 + $0x38] sm:$0xff] }
  0x98   :  { %898 = vmatprep.subr.bf16.mxu0 %v897_v23  ;;  %v915_v21 = vpack.c.bf16 %v595_v20, %v594_v19  ;;  %v613_v23 = vld [vmem:[#allocation7 + $0xc8] sm:$0xff] }
  0x99   :  { %v917_v24 = vpack.c.bf16 %v613_v23, %v612_v22 }
  0x9b   :  { %900 = vmatpush1.bf16.msra.mxu0 %v899_v26  ;;  %v597_v26 = vld [vmem:[#allocation7 + $0x48] sm:$0xff] }
  0x9c   :  { %v919_v27 = vpack.c.bf16 %v597_v26, %v596_v25 }
 0x129   :  { %v194_v37 = vpop.f32.mrb[0].mxu0 }
 0x12a   :  { %v195_v38 = vadd.f32 %v194_v37, %v104_v35  ;;  %v196_v39 = vpop.f32.mrb[1].mxu0  ;;  %v616_v37 = vld [vmem:[#allocation7 + $0xe0] sm:$0xff] }
 0x12b   :  { %v197_v41 = vadd.f32 %v196_v39, %v108_v36 }
 0x12d   :  { %952 = vtanh.f32 %v197_v41  ;;  %v200_v43 = vpop.f32.mrb[2].mxu0  ;;  %v601_v41 = vld [vmem:[#allocation7 + $0x68] sm:$0xff] }
 0x12e   :  { %954 = vtanh.f32 %v195_v38  ;;  %v201_v44 = vadd.f32 %v200_v43, %v104_v35  ;;  %v202_v45 = vpop.f32.mrb[3].mxu0  ;;  %v599_v35 = vld [vmem:[#allocation7 + $0x58] sm:$0xff]  ;;  %v617_v38 = vld [vmem:[#allocation7 + $0xe8] sm:$0xff]  ;;  %v927_v42 = vpack.c.bf16 %v601_v41, %v600_v40  ;;  %v618_v43 = vld [vmem:[#allocation7 + $0xf0] sm:$0xff] }
 0x12f   :  { %v203_v47 = vadd.f32 %v202_v45, %v108_v36  ;;  %v923_v36 = vpack.c.bf16 %v599_v35, %v598_v33  ;;  %v925_v39 = vpack.c.bf16 %v617_v38, %v616_v37  ;;  %v602_v45 = vld [vmem:[#allocation7 + $0x70] sm:$0xff] }
 0x131   :  { %956 = vtanh.f32 %v203_v47  ;;  %v271_v49 = vpop.f32.mrb[4].mxu0  ;;  %v603_v47 = vld [vmem:[#allocation7 + $0x78] sm:$0xff] }
 0x132   :  { %958 = vtanh.f32 %v201_v44  ;;  %v272_v50 = vadd.f32 %v271_v49, %v112_v46  ;;  %v273_v51 = vpop.f32.mrb[5].mxu0  ;;  %v619_v44 = vld [vmem:[#allocation7 + $0xf8] sm:$0xff]  ;;  %v418_v49 = vld [vmem:[%s1224_s4] sm:$0x3] }
 0x133   :  { %v274_v52 = vadd.f32 %v273_v51, %v116_v48  ;;  %v427_v53 = vrot.slane %v418_v49, %v107_v34 }
 0x135   :  { %960 = vtanh.f32 %v274_v52  ;;  %v277_v57 = vpop.f32.mrb[6].mxu0  ;;  %v423_v52 = vrot.slane %v418_v49, %v103_v32 }
 0x136   :  { %962 = vtanh.f32 %v272_v50  ;;  %v278_v58 = vadd.f32 %v277_v57, %v112_v46  ;;  %v279_v59 = vpop.f32.mrb[7].mxu0  ;;  %v929_v46 = vpack.c.bf16 %v619_v44, %v618_v43 }
 0x137   :  { %v953_v61 = vpop.eup %952  ;;  %v280_v62 = vadd.f32 %v279_v59, %v116_v48  ;;  %v931_v48 = vpack.c.bf16 %v603_v47, %v602_v45 }
 0x138   :  { %v955_v3 = vpop.eup %954  ;;  %494 = vmatprep.mubr.f32.mxu1 %v953_v61 }
 0x139   :  { %964 = vtanh.f32 %v280_v62  ;;  %495 = vmatmul.mubr.f32.vlgmr.msra.gmra.mrb[0].mxu1 %v955_v3 }
 0x13a   :  { %966 = vtanh.f32 %v278_v58  ;;  %904 = vmatpush3.bf16.msra.mxu1 %v903_v60 }
 0x13b   :  { %v957_v5 = vpop.eup %956  ;;  %906 = vmatprep.subr.bf16.mxu1 %v905_v63 }
 0x13c   :  { %v959_v6 = vpop.eup %958  ;;  %500 = vmatprep.mubr.f32.mxu1 %v957_v5 }
 0x13d   :  { %501 = vmatmul.mubr.f32.gmra.mrb[2].mxu1 %v959_v6 }
 0x13e   :  { %908 = vmatpush3.bf16.msra.mxu1 %v907_v4 }
 0x13f   :  { %v961_v7 = vpop.eup %960  ;;  %910 = vmatprep.subr.bf16.mxu1 %v909_v13 }
 0x140   :  { %v963_v8 = vpop.eup %962  ;;  %571 = vmatprep.mubr.f32.mxu0 %v961_v7  ;;  %v718_v7 = vld [vmem:[%s1226_s6] ss:$0 sm:$0xff] }
 0x141   :  { %572 = vmatmul.mubr.f32.vlgmr.msra.gmra.mrb[8].mxu0 %v963_v8 }
 0x142   :  { %912 = vmatpush3.bf16.msra.mxu1 %v911_v16 }
 0x143   :  { %v965_v9 = vpop.eup %964  ;;  %914 = vmatprep.subr.bf16.mxu1 %v913_v18 }
 0x144   :  { %v967_v10 = vpop.eup %966  ;;  %577 = vmatprep.mubr.f32.mxu0 %v965_v9 }
 0x145   :  { %578 = vmatmul.mubr.f32.gmra.mrb[10].mxu0 %v967_v10 }
 0x146   :  { %916 = vmatpush3.bf16.msra.mxu1 %v915_v21 }
 0x147   :  { %918 = vmatprep.subr.bf16.mxu1 %v917_v24 }
 0x14a   :  { %920 = vmatpush3.bf16.msra.mxu1 %v919_v27 }
 0x14b   :  { %922 = vmatprep.subr.bf16.mxu1 %v921_v30 }
 0x14e   :  { %924 = vmatpush3.bf16.msra.mxu1 %v923_v36 }
 0x14f   :  { %926 = vmatprep.subr.bf16.mxu1 %v925_v39 }
 0x152   :  { %928 = vmatpush3.bf16.msra.mxu1 %v927_v42 }
 0x153   :  { %930 = vmatprep.subr.bf16.mxu1 %v929_v46 }
 0x156   :  { %932 = vmatpush3.bf16.msra.mxu1 %v931_v48 }
 0x20c   :  { %v496_v50 = vpop.f32.mrb[0].mxu1 }
 0x20d   :  { %v498_v51 = vpop.f32.mrb[1].mxu1  ;;  %v497_v56 = vadd.f32 %v496_v50, %v423_v52 }
 0x20e   :  { %v499_v57 = vadd.f32 %v498_v51, %v427_v53 }
 0x210   :  { %v502_v54 = vpop.f32.mrb[2].mxu1 }
 0x211   :  { %v504_v55 = vpop.f32.mrb[3].mxu1  ;;  %v503_v62 = vadd.f32 %v502_v54, %v423_v52 }
 0x212   :  { %v505_v63 = vadd.f32 %v504_v55, %v427_v53 }
 0x214   :  { %v573_v58 = vpop.f32.mrb[8].mxu0 }
 0x215   :  { %v574_v59 = vadd.f32 %v573_v58, %v497_v56  ;;  %v575_v60 = vpop.f32.mrb[9].mxu0 }
 0x216   :  { %v576_v61 = vadd.f32 %v575_v60, %v499_v57 }
 0x218   :  { %968 = vtanh.f32 %v576_v61  ;;  %v579_v1 = vpop.f32.mrb[10].mxu0 }
 0x219   :  { %970 = vtanh.f32 %v574_v59  ;;  %v580_v2 = vadd.f32 %v579_v1, %v503_v62  ;;  %v581_v3 = vpop.f32.mrb[11].mxu0 }
 0x21a   :  { %v582_v4 = vadd.f32 %v581_v3, %v505_v63 }
 0x21c   :  { %972 = vtanh.f32 %v582_v4 }
 0x21d   :  { %974 = vtanh.f32 %v580_v2 }
 0x222   :  { %v969_v31 = vpop.eup %968 }
 0x223   :  { %v971_v32 = vpop.eup %970  ;;  %691 = vmatprep.mubr.f32.mxu1 %v969_v31 }
 0x224   :  { %692 = vmatmul.mubr.f32.vlgmr.msra.gmra.mrb[4].mxu1 %v971_v32 }
 0x226   :  { %v973_v34 = vpop.eup %972 }
 0x227   :  { %v975_v5 = vpop.eup %974  ;;  %696 = vmatprep.mubr.f32.mxu1 %v973_v34 }
 0x228   :  { %697 = vmatmul.mubr.f32.gmra.mrb[6].mxu1 %v975_v5 }
 0x2f7   :  { %v751_v6 = vpop.f32.mrb[4].mxu1 }
 0x2f8   :  { %v752_v8 = vpop.f32.mrb[5].mxu1 }
 0x2f9   :  { %v753_v9 = vadd.f32 %v752_v8, %v751_v6 }
 0x2fb   :  { %v694_v10 = vadd.f32 %v753_v9, %v718_v7  ;;  %v754_v11 = vpop.f32.mrb[6].mxu1 }
 0x2fc   :  { %v755_v12 = vpop.f32.mrb[7].mxu1 }
 0x2fd   :  { %976 = vtanh.f32 %v694_v10  ;;  %v756_v13 = vadd.f32 %v755_v12, %v754_v11 }
 0x2ff   :  { %v699_v14 = vadd.f32 %v756_v13, %v718_v7 }
 0x301   :  { %978 = vtanh.f32 %v699_v14 }
 0x307   :  { %v977_v15 = vpop.eup %976 }
 0x308   :  { %705 = vst.msk [vmem:[%s1227_s7] sm:$0xff] %vm704_vm1, %v977_v15 }
 0x30b   :  { %v979_v16 = vpop.eup %978 }
 0x30c   :  { %706 = vst.msk [vmem:[%s1227_s7 + $0x8] sm:$0xff] %vm704_vm1, %v979_v16 }
 0x30d   :  { %711 = vsyncpa [#allocation3], 1 }
 0x30e   :  { %712 = vsyncpa [#allocation5], 1 }
 0x30f   :  { %713 = vsyncpa [#allocation8], 1 }

</bundles_post_ra>
